<compile_context>
chip_gen: v7x
topology: tpu7x:2x2x1
jax: 0.10.0
libtpu: 0.0.40
codegen_flags: <defaults>
</compile_context>

<pallas_src>
import functools

import jax
import jax.numpy as jnp
from jax.experimental import pallas as pl
from jax.experimental.pallas import tpu as pltpu


_SQRT1_2 = 0.7071067811865476


def _erf_poly(z):
    # Abramowitz & Stegun 7.1.26, |error| <= 1.5e-7.  Keeps PyTorch's exact-erf
    # GELU semantics using only ops guaranteed to lower in Mosaic (exp + VPU).
    a1, a2, a3, a4, a5 = (0.254829592, -0.284496736, 1.421413741,
                          -1.453152027, 1.061405429)
    p = 0.3275911
    s = jnp.where(z >= 0.0, 1.0, -1.0)
    az = jnp.abs(z)
    # NOTE: on v5e (VALU-limited) this divide can be swapped for
    # pl.reciprocal(..., approx=True) to move work onto the EUP slot, at the cost
    # of a small extra error vs the exact erf; kept exact here for the 1e-3 check.
    t = 1.0 / (1.0 + p * az)
    poly = ((((a5 * t + a4) * t + a3) * t + a2) * t + a1) * t
    return s * (1.0 - poly * jnp.exp(-az * az))


def _gelu_exact(h):
    return 0.5 * h * (1.0 + _erf_poly(h * _SQRT1_2))


# ---------------------------------------------------------------------------
# Pallas kernels
# ---------------------------------------------------------------------------
def _router_kernel(x_ref, w_ref, o_ref):
    # (tm, E) @ (E, n_experts) -> (tm, n_experts), f32 output (bias-free router).
    o_ref[...] = jnp.dot(x_ref[...], w_ref[...], preferred_element_type=jnp.float32)


def _moe_ffn_kernel(x_ref, cw_ref, w1_ref, b1_ref, w2_ref, b2_ref, g_ref, beta_ref,
                    o_ref, acc_ref, *, n_experts, eps):
    """Grid = (row_tiles, n_experts); the expert axis is the (innermost) reduction:
    acc += combine_weight[:, e] * FFN_e(x_tile); LayerNorm on the last expert step.
    W1/W2 are VMEM-resident (constant-index blocks); expert slice taken in VMEM."""
    e = pl.program_id(1)

    @pl.when(e == 0)
    def _init():
        acc_ref[...] = jnp.zeros_like(acc_ref)

    x = x_ref[...]                                             # (tm, E), input dtype
    w1 = w1_ref[e]                                             # (E, H), resident in VMEM
    w2 = w2_ref[e]                                             # (H, E), resident in VMEM

    h = jnp.dot(x, w1, preferred_element_type=jnp.float32)
    h = h + b1_ref[...].astype(jnp.float32)                    # (tm, H) f32
    h = _gelu_exact(h)                                         # exact GELU
    y = jnp.dot(h.astype(x.dtype), w2, preferred_element_type=jnp.float32)
    y = y + b2_ref[...].astype(jnp.float32)                    # (tm, E) f32

    # Select this expert's combine-weight column in-register (no dynamic lane slice,
    # no HBM repeat): cw[t, e] is 0 for experts the token did not route to.
    cw = cw_ref[...].astype(jnp.float32)                       # (tm, n_experts) f32
    col = jax.lax.broadcasted_iota(jnp.int32, cw.shape, 1)
    w_e = jnp.sum(jnp.where(col == e, cw, 0.0), axis=-1, keepdims=True)   # (tm, 1)

    acc_ref[...] += w_e * y

    @pl.when(e == n_experts - 1)
    def _finalize():
        a = acc_ref[...]
        mean = jnp.mean(a, axis=-1, keepdims=True)
        d = a - mean
        var = jnp.mean(d * d, axis=-1, keepdims=True)
        norm = d * jax.lax.rsqrt(var + eps)
        o_ref[...] = (norm * g_ref[...].astype(jnp.float32)
                      + beta_ref[...].astype(jnp.float32)).astype(o_ref.dtype)


# ---------------------------------------------------------------------------
# Wrappers
# ---------------------------------------------------------------------------
def _vmem_limit_bytes():
    # Generation-aware VMEM budget: ~80% of physical capacity
    # (~102 MiB on v5e/v6e with 128 MiB, ~52 MiB on v7x with 64 MiB).
    try:
        cap = int(pltpu.get_tpu_info().vmem_capacity_bytes)
    except Exception:
        cap = 64 * 1024 * 1024
    return int(cap * 0.8)


def _row_tile(T, E, H, n_experts, dtype, vmem_limit, max_tm=512):
    """Largest sublane-aligned row tile (<= max_tm) that fits VMEM alongside the
    VMEM-resident expert weights.  tm in the 256-512 range pushes arithmetic
    intensity past the HBM ridge; for T > max_tm this also guarantees >= 2 row
    tiles so the "parallel" axis can be split across v7x's two TensorCores."""
    T8 = max(8, ((T + 7) // 8) * 8)
    if T8 <= max_tm:
        return T8                                   # single tile covers everything
    itemsize = jnp.dtype(dtype).itemsize
    # Resident expert weights (worst case the pipeline keeps two copies of a block).
    weight_bytes = 2 * n_experts * 2 * E * H * itemsize
    # Per row of a tile: x + out (double-buffered), f32 combine, f32 hidden, f32 acc.
    per_row = 4 * E * itemsize + 4 * n_experts + 4 * H + 8 * E
    budget = max(vmem_limit - weight_bytes, 0)
    tm = (budget // per_row) // 8 * 8
    # TODO(synk): if the resident weights alone overflow VMEM (v7x, large H),
    # H-tile the FFN with a third grid axis instead of shrinking tm further.
    return int(max(min(tm, max_tm), 128))


def pallas_router(x2, w_router, tm, vmem_limit):
    T, E = x2.shape
    n_experts = w_router.shape[1]
    return pl.pallas_call(
        _router_kernel,
        out_shape=jax.ShapeDtypeStruct((T, n_experts), jnp.float32),
        grid=(T // tm,),
        in_specs=[
            pl.BlockSpec((tm, E), lambda i: (i, 0)),
            pl.BlockSpec((E, n_experts), lambda i: (0, 0)),
        ],
        out_specs=pl.BlockSpec((tm, n_experts), lambda i: (i, 0)),
        compiler_params=pltpu.CompilerParams(
            dimension_semantics=("parallel",),
            vmem_limit_bytes=vmem_limit),
    )(x2, w_router)


def pallas_moe_ffn(x2, combine, w1, b1, w2, b2, ln_g, ln_b, tm, eps, vmem_limit):
    T, E = x2.shape
    n_experts, _, H = w1.shape
    kernel = functools.partial(_moe_ffn_kernel, n_experts=n_experts, eps=eps)
    return pl.pallas_call(
        kernel,
        out_shape=jax.ShapeDtypeStruct((T, E), x2.dtype),
        grid=(T // tm, n_experts),                               # expert = reduction, innermost
        in_specs=[
            pl.BlockSpec((tm, E), lambda i, e: (i, 0)),              # x row tile
            pl.BlockSpec((tm, n_experts), lambda i, e: (i, 0)),      # combine weights (f32)
            pl.BlockSpec((n_experts, E, H), lambda i, e: (0, 0, 0)), # W1: DMA'd once, VMEM-resident
            pl.BlockSpec((None, 1, H), lambda i, e: (e, 0, 0)),      # b1[e] (tiny per-step DMA)
            pl.BlockSpec((n_experts, H, E), lambda i, e: (0, 0, 0)), # W2: DMA'd once, VMEM-resident
            pl.BlockSpec((None, 1, E), lambda i, e: (e, 0, 0)),      # b2[e] (tiny per-step DMA)
            pl.BlockSpec((1, E), lambda i, e: (0, 0)),               # LN gamma
            pl.BlockSpec((1, E), lambda i, e: (0, 0)),               # LN beta
        ],
        out_specs=pl.BlockSpec((tm, E), lambda i, e: (i, 0)),        # written on last expert step
        scratch_shapes=[pltpu.VMEM((tm, E), jnp.float32)],           # f32 accumulator
        compiler_params=pltpu.CompilerParams(
            dimension_semantics=("parallel", "arbitrary"),
            vmem_limit_bytes=vmem_limit,
        ),
    )(x2, combine, w1, b1, w2, b2, ln_g, ln_b)


def moe_forward(x, params, *, top_k, eps=1e-5, max_tm=512):
    """Returns (layer_norm(moe_output), router_logits) — same as the torch module."""
    B, S, E = x.shape
    n_experts = params["W_router"].shape[1]
    H = params["W1"].shape[2]
    T = B * S
    x2 = x.reshape(T, E)

    vmem_limit = _vmem_limit_bytes()
    tm = _row_tile(T, E, H, n_experts, x.dtype, vmem_limit, max_tm)
    T_pad = ((T + tm - 1) // tm) * tm
    x2p = jnp.pad(x2, ((0, T_pad - T), (0, 0))) if T_pad != T else x2

    # Router logits in f32 end-to-end so top-k / softmax match the fp32 torch routing.
    logits_f32 = pallas_router(x2p, params["W_router"], tm, vmem_limit)[:T]

    # TODO(synk): torch.topk + softmax routing has no Pallas primitive; plain JAX glue.
    top_vals, top_idx = jax.lax.top_k(logits_f32, top_k)
    top_probs = jax.nn.softmax(top_vals, axis=-1)
    combine = jnp.sum(
        jax.nn.one_hot(top_idx, n_experts, dtype=jnp.float32) * top_probs[..., None],
        axis=-2)                                                   # (T, n_experts), f32
    if T_pad != T:
        combine = jnp.pad(combine, ((0, T_pad - T), (0, 0)))

    out_p = pallas_moe_ffn(x2p, combine,
                           params["W1"], params["b1"],
                           params["W2"], params["b2"],
                           params["ln_g"], params["ln_b"], tm, eps, vmem_limit)
    out = out_p[:T].reshape(B, S, E)
    return out, logits_f32.reshape(B, S, n_experts).astype(x.dtype)


# ---------------------------------------------------------------------------
# Pure-JAX reference (same math, no Pallas) for a sanity check.
# ---------------------------------------------------------------------------
def moe_forward_ref(x, params, *, top_k, eps=1e-5):
    n_experts = params["W_router"].shape[1]
    logits = x @ params["W_router"]
    top_vals, top_idx = jax.lax.top_k(logits, top_k)
    top_probs = jax.nn.softmax(top_vals, axis=-1)
    combine = jnp.sum(jax.nn.one_hot(top_idx, n_experts, dtype=x.dtype)
                      * top_probs[..., None], axis=-2)             # (B,S,n_experts)
    out = jnp.zeros_like(x)
    for e in range(n_experts):
        h = x @ params["W1"][e] + params["b1"][e]
        h = 0.5 * h * (1.0 + jax.lax.erf(h * _SQRT1_2))            # exact GELU
        y = h @ params["W2"][e] + params["b2"][e]
        out = out + combine[..., e:e + 1] * y
    mean = out.mean(-1, keepdims=True)
    var = ((out - mean) ** 2).mean(-1, keepdims=True)
    out = (out - mean) * jax.lax.rsqrt(var + eps)
    out = out * params["ln_g"] + params["ln_b"]
    return out, logits


# ---------------------------------------------------------------------------
if __name__ == "__main__":
    # Small config consistent with the module: n_embd=32, moe_num_experts=4,
    # moe_top_k=2, expert hidden = 4*n_embd = 128.
    B, S = 2, 8
    n_embd, n_experts, top_k = 32, 4, 2
    hidden = 4 * n_embd

    key = jax.random.PRNGKey(0)
    ks = jax.random.split(key, 8)

    def init(k, shape, s=0.02):
        return jax.random.normal(k, shape, jnp.float32) * s

    params = {
        "W_router": init(ks[0], (n_embd, n_experts)),
        "W1": init(ks[1], (n_experts, n_embd, hidden)),
        "b1": init(ks[2], (n_experts, 1, hidden)),
        "W2": init(ks[3], (n_experts, hidden, n_embd)),
        "b2": init(ks[4], (n_experts, 1, n_embd)),
        "ln_g": 1.0 + init(ks[5], (1, n_embd)),
        "ln_b": init(ks[6], (1, n_embd)),
    }
    x = jax.random.normal(ks[7], (B, S, n_embd), jnp.float32)

    out, logits = moe_forward(x, params, top_k=top_k)
    out = jax.block_until_ready(out)

    out_ref, logits_ref = moe_forward_ref(x, params, top_k=top_k)
    assert out.shape == (B, S, n_embd)
    assert logits.shape == (B, S, n_experts)
    assert jnp.allclose(logits, logits_ref, atol=1e-4, rtol=1e-4), "router mismatch"
    assert jnp.allclose(out, out_ref, atol=1e-3, rtol=1e-3), "MoE output mismatch"

    print("KERNEL_OK")
</pallas_src>

<mosaic_0001>
module attributes {stable_mosaic.version = 11 : i64} {
  func.func @_router_kernel(%arg0: i32, %arg1: memref<16x32xf32, #tpu.memory_space<vmem>>, %arg2: memref<32x4xf32, #tpu.memory_space<vmem>>, %arg3: memref<16x4xf32, #tpu.memory_space<vmem>>) attributes {dimension_semantics = [#tpu.dimension_semantics<parallel>], iteration_bounds = array<i64: 1>, scalar_prefetch = 0 : i64, scratch_operands = 0 : i64, tpu.core_type = #tpu.core_type<tc>, window_params = [{transform_indices = @transform_0, window_bounds = array<i64: 16, 32>}, {pipeline_mode = #tpu.pipeline_mode<synchronous>, transform_indices = @transform_1, window_bounds = array<i64: 32, 4>}, {transform_indices = @transform_2, window_bounds = array<i64: 16, 4>}]} {
    %c0 = arith.constant 0 : index
    %c0_0 = arith.constant 0 : index
    %0 = vector.load %arg1[%c0, %c0_0] : memref<16x32xf32, #tpu.memory_space<vmem>>, vector<16x32xf32>
    %c0_1 = arith.constant 0 : index
    %c0_2 = arith.constant 0 : index
    %1 = vector.load %arg2[%c0_1, %c0_2] : memref<32x4xf32, #tpu.memory_space<vmem>>, vector<32x4xf32>
    %cst = arith.constant dense<0.000000e+00> : vector<16x4xf32>
    %2 = tpu.matmul %0, %1, %cst {dimension_numbers = #tpu.dot_dimension_numbers<[1], [0], [0], [1], [0, 0, 1, 1], [], []>} : vector<16x32xf32>, vector<32x4xf32>, vector<16x4xf32> -> vector<16x4xf32>
    %c0_3 = arith.constant 0 : index
    %c0_4 = arith.constant 0 : index
    %3 = vector.load %arg3[%c0_3, %c0_4] : memref<16x4xf32, #tpu.memory_space<vmem>>, vector<16x4xf32>
    tpu.vector_store %arg3[%c0_3, %c0_4], %2 {strides = array<i32>} : memref<16x4xf32, #tpu.memory_space<vmem>>, vector<16x4xf32>,
    return
  }
  func.func @transform_0(%arg0: i32) -> (i32, i32) {
    %c0_i32 = arith.constant 0 : i32
    %c0_i32_0 = arith.constant 0 : i32
    return %arg0, %c0_i32 : i32, i32
  }
  func.func @transform_1(%arg0: i32) -> (i32, i32) {
    %c0_i32 = arith.constant 0 : i32
    %c0_i32_0 = arith.constant 0 : i32
    %c0_i32_1 = arith.constant 0 : i32
    return %c0_i32, %c0_i32_0 : i32, i32
  }
  func.func @transform_2(%arg0: i32) -> (i32, i32) {
    %c0_i32 = arith.constant 0 : i32
    %c0_i32_0 = arith.constant 0 : i32
    return %arg0, %c0_i32 : i32, i32
  }
}

</mosaic_0001>

<bundles_post_ra>
// kernel: tpu_custom_call.1
= control target key start
LH: loop header
LB: loop body
LE: loop exit
PB: predicated region body
PF: predicated region fallthrough
CT: control target
= control target key end

     0   :  { %vm17_vm0 = vcmask 261120   ;;  %vm99_vm1 = vcmask 31744   ;;  %s172_s1 = inlined_call_operand.vmem [shape: f32[32,4], index: 1, kind: input, shape index: {}]   ;;  %s173_s0 = inlined_call_operand.vmem [shape: f32[16,32], index: 0, kind: input, shape index: {}]   ;;  %s174_s2 = inlined_call_operand.vmem [shape: f32[16,4], index: 2, kind: output, shape index: {}]  }
   0x1   :  { %v13_v0 = vld [vmem:[%s172_s1] sm:$0xff]  ;;  %v14_v1 = vld [vmem:[%s172_s1 + $0x8] sm:$0xff]  ;;  %v15_v2 = vld [vmem:[%s172_s1 + $0x10] sm:$0xff] }
   0x2   :  { %v125_v3 = vpack.c.bf16 %v14_v1, %v13_v0  ;;  %v16_v4 = vld [vmem:[%s172_s1 + $0x18] sm:$0xff]  ;;  %v11_v5 = vld [vmem:[%s173_s0] sm:$0xff]  ;;  %v12_v7 = vld [vmem:[%s173_s0 + $0x8] sm:$0xff] }
   0x3   :  { %v129_v6 = vpack.c.bf16 %v16_v4, %v15_v2  ;;  %122 = vmatprep.mubr.msk.f32.mxu0 %vm17_vm0, %v11_v5 }
   0x4   :  { %126 = vmatprep.subr.bf16.mxu0 %v125_v3 }
   0x5   :  { %128 = vmatpush3.bf16.msra.mxu0 %v125_v3 }
   0x6   :  { %130 = vmatprep.subr.bf16.mxu0 %v129_v6 }
   0x9   :  { %132 = vmatpush3.bf16.msra.mxu0 %v129_v6 }
   0xc   :  { %123 = vmatmul.mubr.msk.f32.vlgmr.msra.gmra.mrb[0].mxu0 %vm17_vm0, %v12_v7 }
  0xdf   :  { %v124_v8 = vpop.f32.mrb[0].mxu0 }
  0xe0   :  { %101 = vst.msk [vmem:[%s174_s2 + $0x8] sm:$0xff] %vm99_vm1, %v124_v8  ;;  %v90_v9 = vpop.f32.mrb[1].mxu0 }
  0xe1   :  { %100 = vst.msk [vmem:[%s174_s2] sm:$0xff] %vm99_vm1, %v90_v9 }

</bundles_post_ra>
